<compile_context>
chip_gen: v7x
topology: tpu7x:2x2x1
jax: 0.10.0
libtpu: 0.0.40
codegen_flags: <defaults>
</compile_context>

<pallas_src>
import functools

import jax
import jax.numpy as jnp
from jax.experimental import pallas as pl
from jax.experimental.pallas import tpu as pltpu

_LANE = 128
_SUBLANE = 8
# Large-batch tile: multiple of 256 (v6e/v7x MXU row height); x double-buffer
# at 1024x784 f32 is ~6.4 MiB, far below the scoped-VMEM ceiling everywhere.
_DEFAULT_TB = 1024


def _round_up(x, m):
    return (x + m - 1) // m * m


def _pick_tb(batch):
    """Batch tile: one tile for small B, >=2 tiles for moderate B (v7x
    megacore), capped at _DEFAULT_TB for large B."""
    if batch <= 256:
        return _round_up(max(batch, 1), _SUBLANE)
    if batch <= 2 * _DEFAULT_TB:
        return _round_up(pl.cdiv(batch, 2), _SUBLANE)
    return _DEFAULT_TB


def _linear_kernel(x_ref, w_ref, b_ref, o_ref):
    # x: (TB, D), w: (D, N_pad) [pre-transposed, N zero-padded to 128],
    # b: (1, N_pad), o: (TB, N) with N <= N_pad.
    acc = jnp.dot(x_ref[...], w_ref[...], preferred_element_type=jnp.float32)
    y = acc + b_ref[...]
    # Forward is just the affine map (the original module applies the
    # nonlinearity in the loss), so the epilogue is only the bias add plus a
    # lane-slice down to the true output width (masked store, N=10).
    o_ref[...] = y[:, : o_ref.shape[1]].astype(o_ref.dtype)


def prepare_params(weight, bias):
    """One-time packing of PyTorch-layout params.

    weight: (N, D) -> (D, N_pad) transposed + zero-padded to a lane multiple.
    bias:   (N,)   -> (1, N_pad).
    Do this once per parameter update, not per forward call.
    """
    n_out, d = weight.shape
    n_pad = _round_up(n_out, _LANE)
    w_p = jnp.zeros((d, n_pad), weight.dtype).at[:, :n_out].set(weight.T)
    b_p = jnp.zeros((1, n_pad), bias.dtype).at[0, :n_out].set(bias)
    return w_p, b_p


@functools.partial(jax.jit, static_argnames=("n_out",))
def logistic_forward_packed(x, w_p, b_p, n_out):
    """x: (B, D), w_p: (D, N_pad), b_p: (1, N_pad) -> (B, n_out)."""
    batch, d = x.shape
    tb = _pick_tb(batch)
    grid = (pl.cdiv(batch, tb),)

    return pl.pallas_call(
        _linear_kernel,
        out_shape=jax.ShapeDtypeStruct((batch, n_out), x.dtype),
        grid=grid,
        in_specs=[
            # x tiled over the batch only; last dim = full extent (no K pad).
            pl.BlockSpec((tb, d), lambda i: (i, 0)),
            # Weight / bias: same block every step -> VMEM-resident.
            pl.BlockSpec(w_p.shape, lambda i: (0, 0)),
            pl.BlockSpec(b_p.shape, lambda i: (0, 0)),
        ],
        # Unpadded output: last dim equals full extent (10), so no padded
        # HBM buffer + wrapper slice round trip.
        out_specs=pl.BlockSpec((tb, n_out), lambda i: (i, 0)),
        compiler_params=pltpu.CompilerParams(
            dimension_semantics=("parallel",),
            vmem_limit_bytes=48 * 1024 * 1024,
        ),
    )(x, w_p, b_p)


def logistic_forward(x, weight, bias):
    """Convenience one-shot wrapper: Logistic.forward(xb) == xb @ W.T + b."""
    w_p, b_p = prepare_params(weight, bias)
    return logistic_forward_packed(x, w_p, b_p, weight.shape[0])


if __name__ == "__main__":
    # Shapes implied by the module: D = X.shape[1] = 784 (MNIST), numY = 10.
    D, NUMY = 784, 10

    key = jax.random.PRNGKey(0)
    kx, kw, kb, kx2 = jax.random.split(key, 4)

    # Random params so the matmul + bias path is actually validated.
    weight = 0.02 * jax.random.normal(kw, (NUMY, D), dtype=jnp.float32)
    bias = 0.02 * jax.random.normal(kb, (NUMY,), dtype=jnp.float32)
    w_p, b_p = prepare_params(weight, bias)

    # Small batch (single tile).
    x = jax.random.normal(kx, (8, D), dtype=jnp.float32)
    out = jax.block_until_ready(logistic_forward_packed(x, w_p, b_p, NUMY))
    ref = x @ weight.T + bias
    assert out.shape == (8, NUMY)
    assert jnp.allclose(out, ref, atol=1e-4, rtol=1e-4), "mismatch (small batch)"

    # Ragged multi-tile batch (B=300 -> two tiles, exercises OOB-drop path).
    x2 = jax.random.normal(kx2, (300, D), dtype=jnp.float32)
    out2 = jax.block_until_ready(logistic_forward_packed(x2, w_p, b_p, NUMY))
    ref2 = x2 @ weight.T + bias
    assert out2.shape == (300, NUMY)
    assert jnp.allclose(out2, ref2, atol=1e-4, rtol=1e-4), "mismatch (ragged batch)"

    # The original module initializes weight/bias to zero; that is just a
    # special case of the same linear map — check it too.
    out0 = jax.block_until_ready(
        logistic_forward(
            x,
            jnp.zeros((NUMY, D), dtype=jnp.float32),
            jnp.zeros((NUMY,), dtype=jnp.float32),
        )
    )
    assert jnp.allclose(out0, jnp.zeros((8, NUMY), dtype=jnp.float32), atol=1e-6)

    print("KERNEL_OK")
</pallas_src>

<mosaic_0001>
module attributes {stable_mosaic.version = 11 : i64} {
  func.func @_linear_kernel(%arg0: i32, %arg1: memref<8x784xf32, #tpu.memory_space<vmem>>, %arg2: memref<784x128xf32, #tpu.memory_space<vmem>>, %arg3: memref<1x128xf32, #tpu.memory_space<vmem>>, %arg4: memref<8x10xf32, #tpu.memory_space<vmem>>) attributes {dimension_semantics = [#tpu.dimension_semantics<parallel>], iteration_bounds = array<i64: 1>, scalar_prefetch = 0 : i64, scratch_operands = 0 : i64, tpu.core_type = #tpu.core_type<tc>, window_params = [{transform_indices = @transform_0, window_bounds = array<i64: 8, 784>}, {pipeline_mode = #tpu.pipeline_mode<synchronous>, transform_indices = @transform_1, window_bounds = array<i64: 784, 128>}, {pipeline_mode = #tpu.pipeline_mode<synchronous>, transform_indices = @transform_2, window_bounds = array<i64: 1, 128>}, {transform_indices = @transform_3, window_bounds = array<i64: 8, 10>}]} {
    %c0 = arith.constant 0 : index
    %c0_0 = arith.constant 0 : index
    %0 = vector.load %arg1[%c0, %c0_0] : memref<8x784xf32, #tpu.memory_space<vmem>>, vector<8x784xf32>
    %c0_1 = arith.constant 0 : index
    %c0_2 = arith.constant 0 : index
    %1 = vector.load %arg2[%c0_1, %c0_2] : memref<784x128xf32, #tpu.memory_space<vmem>>, vector<784x128xf32>
    %cst = arith.constant dense<0.000000e+00> : vector<8x128xf32>
    %2 = tpu.matmul %0, %1, %cst {dimension_numbers = #tpu.dot_dimension_numbers<[1], [0], [0], [1], [0, 0, 1, 1], [], []>} : vector<8x784xf32>, vector<784x128xf32>, vector<8x128xf32> -> vector<8x128xf32>
    %c0_3 = arith.constant 0 : index
    %c0_4 = arith.constant 0 : index
    %3 = vector.load %arg3[%c0_3, %c0_4] : memref<1x128xf32, #tpu.memory_space<vmem>>, vector<1x128xf32>
    %4 = vector.broadcast %3 : vector<1x128xf32> to vector<8x128xf32>
    %5 = arith.addf %2, %4 : vector<8x128xf32>
    %6 = vector.extract_strided_slice %5 {offsets = [0, 0], sizes = [8, 10], strides = [1, 1]} : vector<8x128xf32> to vector<8x10xf32>
    %c0_5 = arith.constant 0 : index
    %c0_6 = arith.constant 0 : index
    %7 = vector.load %arg4[%c0_5, %c0_6] : memref<8x10xf32, #tpu.memory_space<vmem>>, vector<8x10xf32>
    tpu.vector_store %arg4[%c0_5, %c0_6], %6 {strides = array<i32>} : memref<8x10xf32, #tpu.memory_space<vmem>>, vector<8x10xf32>,
    return
  }
  func.func @transform_0(%arg0: i32) -> (i32, i32) {
    %c0_i32 = arith.constant 0 : i32
    %c0_i32_0 = arith.constant 0 : i32
    return %arg0, %c0_i32 : i32, i32
  }
  func.func @transform_1(%arg0: i32) -> (i32, i32) {
    %c0_i32 = arith.constant 0 : i32
    %c0_i32_0 = arith.constant 0 : i32
    %c0_i32_1 = arith.constant 0 : i32
    return %c0_i32, %c0_i32_0 : i32, i32
  }
  func.func @transform_2(%arg0: i32) -> (i32, i32) {
    %c0_i32 = arith.constant 0 : i32
    %c0_i32_0 = arith.constant 0 : i32
    %c0_i32_1 = arith.constant 0 : i32
    return %c0_i32, %c0_i32_0 : i32, i32
  }
  func.func @transform_3(%arg0: i32) -> (i32, i32) {
    %c0_i32 = arith.constant 0 : i32
    %c0_i32_0 = arith.constant 0 : i32
    return %arg0, %c0_i32 : i32, i32
  }
}

</mosaic_0001>

<bundles_post_ra>
// kernel: logistic_forward_packed.1
= control target key start
LH: loop header
LB: loop body
LE: loop exit
PB: predicated region body
PF: predicated region fallthrough
CT: control target
= control target key end

     0   :  { %8 = vsyncpa [#allocation3], 0  ;;  %s825_s0 = inlined_call_operand.hbm [shape: f32[8,784], index: 0, kind: input, shape index: {}]   ;;  %s826_s1 = inlined_call_operand.hbm [shape: f32[784,128], index: 1, kind: input, shape index: {}]   ;;  %s827_s2 = inlined_call_operand.vmem [shape: f32[1,128], index: 2, kind: input, shape index: {}]   ;;  %s828_s3 = inlined_call_operand.hbm [shape: f32[8,10], index: 3, kind: output, shape index: {}]  }
   0x1   :  { %9 = vsyncpa [#allocation6], 0 }
   0x2   :  { %10 = vsyncpa [#allocation4], 0  ;;  %s751_s12 = smov [#allocation2]   ;;  %s752_s14 = smov [#allocation5]  }
   0x3   :  { %s17_s13 = sshll.u32 %s751_s12, 4  ;;  %s26_s15 = sshll.u32 %s752_s14, 4  ;;  %s18_s13 = int_to_ptr.vmem [resolvable:$true] %s17_s13  ;;  %s779_s15 = int_to_ptr.vmem [resolvable:$true] %s26_s15 }
   0x4   :  { %s679_s18 = scalar_lea.hbm %s825_s0, 896 }
   0x5   :  { %p680_p0 = scmp.ne.s32.totalorder %s825_s0, %s679_s18  ;;  %p683_p1 = scmp.lt.u32.totalorder %s679_s18, %s825_s0 }
   0x7   :  { %p685_p2 = pnand %p683_p1, %p680_p0 }
   0x9   :  { %688 = shalt.err (!%p685_p2)
}
   0xa   :  { %s689_s23 = scalar_lea.vmem %s18_s13, 896  ;;  %p694_p4 = scmp.lt.s32.totalorder %s18_s13, %s18_s13 }
   0xb   :  { %p690_p3 = scmp.ne.s32.totalorder %s18_s13, %s689_s23  ;;  %p695_p5 = scmp.lt.s32.totalorder %s689_s23, %s689_s23 }
   0xd   :  { %p696_p6 = por %p695_p5, %p694_p4 }
   0xf   :  { %p697_p7 = pnand %p696_p6, %p690_p3 }
  0x11   :  { %700 = shalt.err (!%p697_p7)
}
  0x12   :  { %20 = dma.hbm_to_vmem [thread:$0]  %s825_s0, 896, %s18_s13, [#allocation3]  }
  0x13   :  { %s701_s28 = scalar_lea.hbm %s826_s1, 12544 }
  0x14   :  { %p702_p8 = scmp.ne.s32.totalorder %s826_s1, %s701_s28  ;;  %p705_p9 = scmp.lt.u32.totalorder %s701_s28, %s826_s1 }
  0x16   :  { %p707_p10 = pnand %p705_p9, %p702_p8 }
  0x18   :  { %710 = shalt.err (!%p707_p10)
}
  0x19   :  { %s711_s6 = scalar_lea.vmem %s779_s15, 12544  ;;  %p716_p12 = scmp.lt.s32.totalorder %s779_s15, %s779_s15 }
  0x1a   :  { %p712_p11 = scmp.ne.s32.totalorder %s779_s15, %s711_s6  ;;  %p717_p13 = scmp.lt.s32.totalorder %s711_s6, %s711_s6 }
  0x1c   :  { %p718_p0 = por %p717_p13, %p716_p12 }
  0x1e   :  { %p719_p1 = pnand %p718_p0, %p712_p11 }
  0x20   :  { %722 = shalt.err (!%p719_p1)
}
  0x21   :  { %s753_s0 = smov 128   ;;  %s754_s7 = smov 8  }
  0x22   :  { %32 = dma.hbm_to_vmem [thread:$0]  %s826_s1, 12544, %s779_s15, [#allocation6], %s753_s0, %s753_s0, %s754_s7  }
  0x23   :  { %745 = dma.done.wait [#allocation3], 896  }
  0x24   :  { %746 = vsyncadd [#allocation3], 4294966400 }
  0x25   :  { %747 = dma.done.wait [#allocation6], 12544  }
  0x26   :  { %748 = vsyncadd [#allocation6], 4294954752  ;;  %v64_v0 = vld [vmem:[#allocation5 + $0x80] sm:$0xff]  ;;  %v65_v1 = vld [vmem:[#allocation5 + $0x88] sm:$0xff]  ;;  %vm756_vm0 = vmmov 0   ;;  %vm153_vm1 = vcmask 130048  }
  0x27   :  { %v48_v2 = vld [vmem:[#allocation5] sm:$0xff]  ;;  %v572_v3 = vpack.c.bf16 %v65_v1, %v64_v0  ;;  %v49_v4 = vld [vmem:[#allocation5 + $0x8] sm:$0xff]  ;;  %v66_v11 = vld [vmem:[#allocation5 + $0x90] sm:$0xff]  ;;  %s758_s11 = smov [#allocation7]   ;;  %vm437_vm2 = vcmask 80896  }
  0x28   :  { %v96_v5 = vld [vmem:[#allocation5 + $0x180] sm:$0xff]  ;;  %v97_v6 = vld [vmem:[#allocation5 + $0x188] sm:$0xff]  ;;  %v574_v7 = vpack.c.bf16 %v49_v4, %v48_v2  ;;  %v67_v13 = vld [vmem:[#allocation5 + $0x98] sm:$0xff]  ;;  %s445_s12 = sshll.u32 %s758_s11, 4  ;;  %s446_s12 = int_to_ptr.vmem [resolvable:$true] %s445_s12 }
  0x29   :  { %v604_v8 = vpack.c.bf16 %v97_v6, %v96_v5  ;;  %v80_v9 = vld [vmem:[#allocation5 + $0x100] sm:$0xff]  ;;  %v81_v10 = vld [vmem:[#allocation5 + $0x108] sm:$0xff]  ;;  %573 = vmatprep.subr.bf16.mxu0 %v572_v3  ;;  %v50_v14 = vld [vmem:[#allocation5 + $0x10] sm:$0xff]  ;;  %v576_v16 = vpack.c.bf16 %v67_v13, %v66_v11  ;;  %p728_p3 = scmp.lt.s32.totalorder %s446_s12, %s446_s12 }
  0x2a   :  { %v606_v12 = vpack.c.bf16 %v81_v10, %v80_v9  ;;  %v51_v15 = vld [vmem:[#allocation5 + $0x18] sm:$0xff]  ;;  %575 = vmatpush3.bf16.msra.mxu0 %v574_v7  ;;  %v98_v18 = vld [vmem:[#allocation5 + $0x190] sm:$0xff]  ;;  %v68_v23 = vld [vmem:[#allocation5 + $0xa0] sm:$0xff] }
  0x2b   :  { %605 = vmatprep.subr.bf16.mxu1 %v604_v8  ;;  %v578_v17 = vpack.c.bf16 %v51_v15, %v50_v14  ;;  %v99_v19 = vld [vmem:[#allocation5 + $0x198] sm:$0xff]  ;;  %v82_v20 = vld [vmem:[#allocation5 + $0x110] sm:$0xff]  ;;  %v69_v24 = vld [vmem:[#allocation5 + $0xa8] sm:$0xff]  ;;  %577 = vmatprep.subr.bf16.mxu0 %v576_v16 }
  0x2c   :  { %607 = vmatpush3.bf16.msra.mxu1 %v606_v12  ;;  %v608_v21 = vpack.c.bf16 %v99_v19, %v98_v18  ;;  %v83_v22 = vld [vmem:[#allocation5 + $0x118] sm:$0xff]  ;;  %v580_v26 = vpack.c.bf16 %v69_v24, %v68_v23  ;;  %v52_v27 = vld [vmem:[#allocation5 + $0x20] sm:$0xff]  ;;  %v53_v28 = vld [vmem:[#allocation5 + $0x28] sm:$0xff] }
  0x2d   :  { %v610_v25 = vpack.c.bf16 %v83_v22, %v82_v20  ;;  %v100_v29 = vld [vmem:[#allocation5 + $0x1a0] sm:$0xff]  ;;  %v101_v30 = vld [vmem:[#allocation5 + $0x1a8] sm:$0xff]  ;;  %v582_v33 = vpack.c.bf16 %v53_v28, %v52_v27  ;;  %v70_v35 = vld [vmem:[#allocation5 + $0xb0] sm:$0xff] }
  0x2e   :  { %609 = vmatprep.subr.bf16.mxu1 %v608_v21  ;;  %v84_v31 = vld [vmem:[#allocation5 + $0x120] sm:$0xff]  ;;  %v85_v32 = vld [vmem:[#allocation5 + $0x128] sm:$0xff]  ;;  %579 = vmatpush3.bf16.msra.mxu0 %v578_v17  ;;  %v612_v34 = vpack.c.bf16 %v101_v30, %v100_v29  ;;  %v71_v36 = vld [vmem:[#allocation5 + $0xb8] sm:$0xff] }
  0x2f   :  { %v54_v37 = vld [vmem:[#allocation5 + $0x30] sm:$0xff]  ;;  %581 = vmatprep.subr.bf16.mxu0 %v580_v26  ;;  %v614_v38 = vpack.c.bf16 %v85_v32, %v84_v31  ;;  %v584_v39 = vpack.c.bf16 %v71_v36, %v70_v35  ;;  %v55_v40 = vld [vmem:[#allocation5 + $0x38] sm:$0xff]  ;;  %v72_v46 = vld [vmem:[#allocation5 + $0xc0] sm:$0xff] }
  0x30   :  { %611 = vmatpush3.bf16.msra.mxu1 %v610_v25  ;;  %v102_v41 = vld [vmem:[#allocation5 + $0x1b0] sm:$0xff]  ;;  %v103_v42 = vld [vmem:[#allocation5 + $0x1b8] sm:$0xff]  ;;  %v73_v47 = vld [vmem:[#allocation5 + $0xc8] sm:$0xff]  ;;  %v586_v48 = vpack.c.bf16 %v55_v40, %v54_v37 }
  0x31   :  { %613 = vmatprep.subr.bf16.mxu1 %v612_v34  ;;  %v616_v43 = vpack.c.bf16 %v103_v42, %v102_v41  ;;  %v86_v44 = vld [vmem:[#allocation5 + $0x130] sm:$0xff]  ;;  %v87_v45 = vld [vmem:[#allocation5 + $0x138] sm:$0xff]  ;;  %v104_v49 = vld [vmem:[#allocation5 + $0x1c0] sm:$0xff]  ;;  %v588_v52 = vpack.c.bf16 %v73_v47, %v72_v46 }
  0x32   :  { %583 = vmatpush3.bf16.msra.mxu0 %v582_v33  ;;  %v105_v50 = vld [vmem:[#allocation5 + $0x1c8] sm:$0xff]  ;;  %v618_v51 = vpack.c.bf16 %v87_v45, %v86_v44  ;;  %v56_v53 = vld [vmem:[#allocation5 + $0x40] sm:$0xff]  ;;  %v74_v58 = vld [vmem:[#allocation5 + $0xd0] sm:$0xff] }
  0x33   :  { %585 = vmatprep.subr.bf16.mxu0 %v584_v39  ;;  %v57_v54 = vld [vmem:[#allocation5 + $0x48] sm:$0xff]  ;;  %v88_v55 = vld [vmem:[#allocation5 + $0x140] sm:$0xff]  ;;  %v620_v56 = vpack.c.bf16 %v105_v50, %v104_v49  ;;  %v75_v59 = vld [vmem:[#allocation5 + $0xd8] sm:$0xff]  ;;  %v755_v50 = vmov 0.0|0.0  }
  0x34   :  { %615 = vmatpush3.bf16.msra.mxu1 %v614_v38  ;;  %v89_v57 = vld [vmem:[#allocation5 + $0x148] sm:$0xff]  ;;  %v106_v60 = vld [vmem:[#allocation5 + $0x1d0] sm:$0xff]  ;;  %v107_v61 = vld [vmem:[#allocation5 + $0x1d8] sm:$0xff]  ;;  %v590_v62 = vpack.c.bf16 %v57_v54, %v56_v53  ;;  %v592_v0 = vpack.c.bf16 %v75_v59, %v74_v58 }
  0x35   :  { %617 = vmatprep.subr.bf16.mxu1 %v616_v43  ;;  %v622_v63 = vpack.c.bf16 %v89_v57, %v88_v55  ;;  %v58_v1 = vld [vmem:[#allocation5 + $0x50] sm:$0xff]  ;;  %v59_v2 = vld [vmem:[#allocation5 + $0x58] sm:$0xff]  ;;  %v624_v4 = vpack.c.bf16 %v107_v61, %v106_v60  ;;  %v76_v6 = vld [vmem:[#allocation5 + $0xe0] sm:$0xff]  ;;  %v757_v60 = vmov 0.0  }
  0x36   :  { %587 = vmatpush3.bf16.msra.mxu0 %v586_v48  ;;  %v90_v3 = vld [vmem:[#allocation5 + $0x150] sm:$0xff]  ;;  %v91_v5 = vld [vmem:[#allocation5 + $0x158] sm:$0xff]  ;;  %v77_v7 = vld [vmem:[#allocation5 + $0xe8] sm:$0xff]  ;;  %v594_v10 = vpack.c.bf16 %v59_v2, %v58_v1 }
  0x37   :  { %589 = vmatprep.subr.bf16.mxu0 %v588_v52  ;;  %v108_v8 = vld [vmem:[#allocation5 + $0x1e0] sm:$0xff]  ;;  %v109_v9 = vld [vmem:[#allocation5 + $0x1e8] sm:$0xff]  ;;  %v42_v12 = vld [vmem:[#allocation2 + $0x8] sm:$0xff]  ;;  %v626_v13 = vpack.c.bf16 %v91_v5, %v90_v3  ;;  %v596_v14 = vpack.c.bf16 %v77_v7, %v76_v6 }
  0x38   :  { %619 = vmatpush3.bf16.msra.mxu1 %v618_v51  ;;  %v60_v11 = vld [vmem:[#allocation5 + $0x60] sm:$0xff]  ;;  %v61_v15 = vld [vmem:[#allocation5 + $0x68] sm:$0xff]  ;;  %v628_v18 = vpack.c.bf16 %v109_v9, %v108_v8  ;;  %v78_v19 = vld [vmem:[#allocation5 + $0xf0] sm:$0xff]  ;;  %221 = vmatprep.mubr.f32.mxu0 %v42_v12 }
  0x39   :  { %621 = vmatprep.subr.bf16.mxu1 %v620_v56  ;;  %v92_v16 = vld [vmem:[#allocation5 + $0x160] sm:$0xff]  ;;  %v93_v17 = vld [vmem:[#allocation5 + $0x168] sm:$0xff]  ;;  %v79_v20 = vld [vmem:[#allocation5 + $0xf8] sm:$0xff]  ;;  %v598_v24 = vpack.c.bf16 %v61_v15, %v60_v11 }
  0x3a   :  { %591 = vmatpush3.bf16.msra.mxu0 %v590_v62  ;;  %v44_v21 = vld [vmem:[#allocation2 + $0x18] sm:$0xff]  ;;  %v110_v22 = vld [vmem:[#allocation5 + $0x1f0] sm:$0xff]  ;;  %v111_v23 = vld [vmem:[#allocation5 + $0x1f8] sm:$0xff]  ;;  %v630_v25 = vpack.c.bf16 %v93_v17, %v92_v16  ;;  %v600_v26 = vpack.c.bf16 %v79_v20, %v78_v19 }
  0x3b   :  { %593 = vmatprep.subr.bf16.mxu0 %v592_v0  ;;  %291 = vmatprep.mubr.f32.mxu1 %v44_v21  ;;  %v62_v27 = vld [vmem:[#allocation5 + $0x70] sm:$0xff]  ;;  %v63_v28 = vld [vmem:[#allocation5 + $0x78] sm:$0xff]  ;;  %v632_v30 = vpack.c.bf16 %v111_v23, %v110_v22  ;;  %v128_v32 = vld [vmem:[#allocation5 + $0x280] sm:$0xff] }
  0x3c   :  { %623 = vmatpush3.bf16.msra.mxu1 %v622_v63  ;;  %v94_v29 = vld [vmem:[#allocation5 + $0x170] sm:$0xff]  ;;  %v95_v31 = vld [vmem:[#allocation5 + $0x178] sm:$0xff]  ;;  %v129_v33 = vld [vmem:[#allocation5 + $0x288] sm:$0xff]  ;;  %v602_v34 = vpack.c.bf16 %v63_v28, %v62_v27 }
  0x3d   :  { %625 = vmatprep.subr.bf16.mxu1 %v624_v4  ;;  %v634_v35 = vpack.c.bf16 %v95_v31, %v94_v29  ;;  %v636_v36 = vpack.c.bf16 %v129_v33, %v128_v32  ;;  %v112_v37 = vld [vmem:[#allocation5 + $0x200] sm:$0xff]  ;;  %v113_v38 = vld [vmem:[#allocation5 + $0x208] sm:$0xff]  ;;  %v130_v39 = vld [vmem:[#allocation5 + $0x290] sm:$0xff] }
  0x3e   :  { %595 = vmatpush3.bf16.msra.mxu0 %v594_v10  ;;  %v131_v40 = vld [vmem:[#allocation5 + $0x298] sm:$0xff]  ;;  %v41_v41 = vld [vmem:[#allocation2] sm:$0xff]  ;;  %v638_v42 = vpack.c.bf16 %v113_v38, %v112_v37  ;;  %v114_v44 = vld [vmem:[#allocation5 + $0x210] sm:$0xff] }
  0x3f   :  { %597 = vmatprep.subr.bf16.mxu0 %v596_v14  ;;  %v43_v43 = vld [vmem:[#allocation2 + $0x10] sm:$0xff]  ;;  %v640_v45 = vpack.c.bf16 %v131_v40, %v130_v39  ;;  %v132_v47 = vld [vmem:[#allocation5 + $0x2a0] sm:$0xff]  ;;  %v133_v48 = vld [vmem:[#allocation5 + $0x2a8] sm:$0xff] }
  0x40   :  { %627 = vmatpush3.bf16.msra.mxu1 %v626_v13  ;;  %v115_v46 = vld [vmem:[#allocation5 + $0x218] sm:$0xff]  ;;  %v46_v49 = vld [vmem:[#allocation2 + $0x28] sm:$0xff]  ;;  %v144_v51 = vld [vmem:[#allocation5 + $0x300] sm:$0xff]  ;;  %v644_v55 = vpack.c.bf16 %v133_v48, %v132_v47 }
  0x41   :  { %629 = vmatprep.subr.bf16.mxu1 %v628_v18  ;;  %v145_v52 = vld [vmem:[#allocation5 + $0x308] sm:$0xff]  ;;  %v642_v54 = vpack.c.bf16 %v115_v46, %v114_v44  ;;  %v116_v56 = vld [vmem:[#allocation5 + $0x220] sm:$0xff]  ;;  %v134_v58 = vld [vmem:[#allocation5 + $0x2b0] sm:$0xff] }
  0x42   :  { %599 = vmatpush3.bf16.msra.mxu0 %v598_v24  ;;  %v669_v53 = vpack.c.bf16 %v145_v52, %v144_v51  ;;  %v117_v57 = vld [vmem:[#allocation5 + $0x228] sm:$0xff]  ;;  %v135_v59 = vld [vmem:[#allocation5 + $0x2b8] sm:$0xff]  ;;  %v118_v0 = vld [vmem:[#allocation5 + $0x230] sm:$0xff] }
  0x43   :  { %601 = vmatprep.subr.bf16.mxu0 %v600_v26  ;;  %v47_v61 = vld [vmem:[#allocation2 + $0x30] sm:$0xff]  ;;  %v646_v62 = vpack.c.bf16 %v117_v57, %v116_v56  ;;  %v648_v63 = vpack.c.bf16 %v135_v59, %v134_v58  ;;  %v136_v2 = vld [vmem:[#allocation5 + $0x2c0] sm:$0xff]  ;;  %v137_v3 = vld [vmem:[#allocation5 + $0x2c8] sm:$0xff] }
  0x44   :  { %631 = vmatpush3.bf16.msra.mxu1 %v630_v25  ;;  %v119_v1 = vld [vmem:[#allocation5 + $0x238] sm:$0xff]  ;;  %v652_v5 = vpack.c.bf16 %v137_v3, %v136_v2  ;;  %v120_v6 = vld [vmem:[#allocation5 + $0x240] sm:$0xff]  ;;  %v121_v7 = vld [vmem:[#allocation5 + $0x248] sm:$0xff] }
  0x45   :  { %633 = vmatprep.subr.bf16.mxu1 %v632_v30  ;;  %v650_v4 = vpack.c.bf16 %v119_v1, %v118_v0  ;;  %v138_v8 = vld [vmem:[#allocation5 + $0x2d0] sm:$0xff]  ;;  %v139_v9 = vld [vmem:[#allocation5 + $0x2d8] sm:$0xff]  ;;  %v654_v10 = vpack.c.bf16 %v121_v7, %v120_v6  ;;  %v140_v14 = vld [vmem:[#allocation5 + $0x2e0] sm:$0xff] }
  0x46   :  { %603 = vmatpush3.bf16.msra.mxu0 %v602_v34  ;;  %v656_v11 = vpack.c.bf16 %v139_v9, %v138_v8  ;;  %v122_v12 = vld [vmem:[#allocation5 + $0x250] sm:$0xff]  ;;  %v123_v13 = vld [vmem:[#allocation5 + $0x258] sm:$0xff]  ;;  %v141_v15 = vld [vmem:[#allocation5 + $0x2e8] sm:$0xff] }
  0x47   :  { %637 = vmatprep.subr.bf16.mxu0 %v636_v36  ;;  %v658_v16 = vpack.c.bf16 %v123_v13, %v122_v12  ;;  %v660_v17 = vpack.c.bf16 %v141_v15, %v140_v14  ;;  %v124_v18 = vld [vmem:[#allocation5 + $0x260] sm:$0xff]  ;;  %v125_v19 = vld [vmem:[#allocation5 + $0x268] sm:$0xff]  ;;  %v142_v20 = vld [vmem:[#allocation5 + $0x2f0] sm:$0xff] }
  0x48   :  { %635 = vmatpush3.bf16.msra.mxu1 %v634_v35  ;;  %v143_v21 = vld [vmem:[#allocation5 + $0x2f8] sm:$0xff]  ;;  %v662_v22 = vpack.c.bf16 %v125_v19, %v124_v18  ;;  %v126_v24 = vld [vmem:[#allocation5 + $0x270] sm:$0xff]  ;;  %v45_v27 = vld [vmem:[#allocation2 + $0x20] sm:$0xff] }
  0x49   :  { %668 = vmatprep.subr.bf16.mxu1 %v755_v50  ;;  %222 = vmatmul.mubr.f32.vlgmr.msra.gmra.mrb[0].mxu0 %v41_v41  ;;  %v664_v23 = vpack.c.bf16 %v143_v21, %v142_v20  ;;  %v127_v25 = vld [vmem:[#allocation5 + $0x278] sm:$0xff]  ;;  %v455_v29 = vld [vmem:[%s827_s2] ss:$0 sm:$0xff]  ;;  %s723_s2 = scalar_lea.vmem %s446_s12, 128 }
  0x4a   :  { %639 = vmatpush3.bf16.msra.mxu0 %v638_v42  ;;  %361 = vmatprep.mubr.f32.mxu0 %v46_v49  ;;  %v666_v26 = vpack.c.bf16 %v127_v25, %v126_v24  ;;  %p724_p2 = scmp.ne.s32.totalorder %s446_s12, %s723_s2  ;;  %p729_p4 = scmp.lt.s32.totalorder %s723_s2, %s723_s2 }
  0x4b   :  { %292 = vmatmul.mubr.f32.vlgmr.msra.gmra.mrb[0].mxu1 %v43_v43  ;;  %641 = vmatprep.subr.bf16.mxu0 %v640_v45 }
  0x4c   :  { %670 = vmatpush3.bf16.msra.mxu1 %v669_v53  ;;  %569 = vmatprep.mubr.msk.f32.mxu1 %vm756_vm0, %v757_v60  ;;  %p730_p5 = por %p729_p4, %p728_p3 }
  0x4e   :  { %643 = vmatpush3.bf16.msra.mxu0 %v642_v54  ;;  %p731_p6 = pnand %p730_p5, %p724_p2 }
  0x4f   :  { %645 = vmatprep.subr.bf16.mxu0 %v644_v55  ;;  %570 = vmatmul.mubr.msk.f32.vlgmr.msra.gmra.mrb[2].mxu1 %vm153_vm1, %v47_v61 }
  0x52   :  { %647 = vmatpush3.bf16.msra.mxu0 %v646_v62 }
  0x53   :  { %649 = vmatprep.subr.bf16.mxu0 %v648_v63 }
  0x56   :  { %651 = vmatpush3.bf16.msra.mxu0 %v650_v4 }
  0x57   :  { %653 = vmatprep.subr.bf16.mxu0 %v652_v5 }
  0x5a   :  { %655 = vmatpush3.bf16.msra.mxu0 %v654_v10 }
  0x5b   :  { %657 = vmatprep.subr.bf16.mxu0 %v656_v11 }
  0x5e   :  { %659 = vmatpush3.bf16.msra.mxu0 %v658_v16 }
  0x5f   :  { %661 = vmatprep.subr.bf16.mxu0 %v660_v17 }
  0x62   :  { %663 = vmatpush3.bf16.msra.mxu0 %v662_v22 }
  0x63   :  { %665 = vmatprep.subr.bf16.mxu0 %v664_v23 }
  0x66   :  { %667 = vmatpush3.bf16.msra.mxu0 %v666_v26 }
  0x69   :  { %362 = vmatmul.mubr.f32.vlgmr.msra.gmra.mrb[2].mxu0 %v45_v27 }
 0x11c   :  { %v489_v28 = vpop.f32.mrb[0].mxu0 }
 0x11d   :  { %v490_v30 = vpop.f32.mrb[1].mxu0 }
 0x11e   :  { %v524_v31 = vpop.f32.mrb[0].mxu1  ;;  %v491_v32 = vadd.f32 %v490_v30, %v489_v28 }
 0x11f   :  { %v525_v33 = vpop.f32.mrb[1].mxu1 }
 0x120   :  { %v526_v34 = vadd.f32 %v525_v33, %v524_v31  ;;  %v224_v35 = vadd.f32 %v491_v32, %v455_v29 }
 0x122   :  { %v294_v36 = vadd.f32 %v526_v34, %v224_v35  ;;  %v433_v37 = vpop.f32.mrb[2].mxu1 }
 0x123   :  { %v571_v38 = vpop.f32.mrb[3].mxu1 }
 0x13c   :  { %v559_v39 = vpop.f32.mrb[2].mxu0 }
 0x13d   :  { %v560_v40 = vpop.f32.mrb[3].mxu0 }
 0x13e   :  { %v561_v41 = vadd.f32 %v560_v40, %v559_v39 }
 0x140   :  { %v364_v42 = vadd.f32 %v561_v41, %v294_v36 }
 0x142   :  { %v434_v43 = vadd.f32 %v433_v37, %v364_v42 }
 0x144   :  { %438 = vst.msk [vmem:[#allocation7] sm:$0xff] %vm437_vm2, %v434_v43 }
 0x145   :  { %734 = shalt.err (!%p731_p6)
}
 0x146   :  { %s735_s15 = scalar_lea.hbm %s828_s3, 128 }
 0x147   :  { %p736_p7 = scmp.ne.s32.totalorder %s828_s3, %s735_s15  ;;  %p739_p8 = scmp.lt.u32.totalorder %s735_s15, %s828_s3 }
 0x149   :  { %p741_p9 = pnand %p739_p8, %p736_p7 }
 0x14b   :  { %744 = shalt.err (!%p741_p9)
}
 0x14c   :  { %448 = dma.vmem_to_hbm [thread:$0]  %s446_s12, 128, %s828_s3, [#allocation4]  }
 0x14d   :  { %749 = dma.done.wait [#allocation4], 128  }
 0x14e   :  { %750 = vsyncadd [#allocation4], 4294967168 }
 0x14f   :  { %452 = vsyncpa [#allocation3], 1 }
 0x150   :  { %453 = vsyncpa [#allocation6], 1 }
 0x151   :  { %454 = vsyncpa [#allocation4], 1 }

</bundles_post_ra>
